<compile_context>
chip_gen: v5e
topology: v5e:2x2
jax: 0.10.0
libtpu: 0.0.40
codegen_flags: <defaults>
</compile_context>

<pallas_src>
import math
import functools

import jax
import jax.numpy as jnp
from jax.experimental import pallas as pl
from jax.experimental.pallas import tpu as pltpu

_LN_EPS = 1e-5

# Capability check instead of a bare `except Exception` around pallas_call
# (which would silently double-buffer all weights and mask lowering errors).
_HAS_BUFFERED = hasattr(pl, "Buffered")


# --------------------------------------------------------------------------- #
# Kernel
# --------------------------------------------------------------------------- #
def mhsa_kernel(xq_ref, xkv_ref,
                wq_ref, wk_ref, wv_ref,
                bq_ref, bk_ref, bv_ref,
                wout_ref, bout_ref, gamma_ref, beta_ref,
                o_ref,
                kh_ref, vh_ref,
                *, num_heads, head_dim):
    """One grid step = (batch element b, query tile qi).

    xq_ref : (Tq, E) query tile of x (residual + Q projection)
    xkv_ref: (S, E) full sequence of x (same block for every qi of a batch)
    kh_ref / vh_ref: (H, S, Dh) bf16 VMEM scratch — K/V cached head-major once
        per batch element (at qi == 0) and reused across all query tiles.
    """
    Tq = xq_ref.shape[0]
    S = xkv_ref.shape[0]
    E = num_heads * head_dim

    # --- K/V projection: only at the first query tile of each batch element.
    # qi is the innermost "arbitrary" grid axis, so qi==0 always precedes the
    # other query tiles of the same b and the scratch carry is well defined.
    @pl.when(pl.program_id(1) == 0)
    def _compute_kv():
        xkv_bf = xkv_ref[...].astype(jnp.bfloat16)
        k = jnp.dot(xkv_bf, wk_ref[...],
                    preferred_element_type=jnp.float32) + bk_ref[...]
        v = jnp.dot(xkv_bf, wv_ref[...],
                    preferred_element_type=jnp.float32) + bv_ref[...]
        # Head-major (H, S, Dh) staging (transpose amortized over all q tiles).
        kh_ref[...] = jnp.transpose(
            k.reshape(S, num_heads, head_dim), (1, 0, 2)).astype(jnp.bfloat16)
        vh_ref[...] = jnp.transpose(
            v.reshape(S, num_heads, head_dim), (1, 0, 2)).astype(jnp.bfloat16)

    # --- Q projection (1/sqrt(head_dim) already folded into wq/bq).
    xq_f32 = xq_ref[...].astype(jnp.float32)        # single VMEM load; residual
    xq_bf = xq_f32.astype(jnp.bfloat16)
    q = jnp.dot(xq_bf, wq_ref[...],
                preferred_element_type=jnp.float32) + bq_ref[...]
    qh = jnp.transpose(
        q.reshape(Tq, num_heads, head_dim), (1, 0, 2)).astype(jnp.bfloat16)   # (H,Tq,Dh)

    # --- scores + stable softmax (normalization deferred onto the context).
    s = jnp.einsum('hqd,hkd->hqk', qh, kh_ref[...],
                   preferred_element_type=jnp.float32)          # (H, Tq, S) f32
    s = s - jnp.max(s, axis=-1, keepdims=True)
    p = jnp.exp(s)
    l = jnp.sum(p, axis=-1, keepdims=True)                      # (H, Tq, 1)

    ctx = jnp.einsum('hqk,hkd->hqd', p.astype(jnp.bfloat16), vh_ref[...],
                     preferred_element_type=jnp.float32)        # (H, Tq, Dh) f32
    # Deferred softmax normalization on the small context tensor; the
    # reciprocal runs on the EUP slot.
    ctx = ctx * pl.reciprocal(l, approx=True)

    # --- merge heads + output projection.
    attn = jnp.transpose(ctx, (1, 0, 2)).reshape(Tq, E)
    attn = jnp.dot(attn.astype(jnp.bfloat16), wout_ref[...],
                   preferred_element_type=jnp.float32) + bout_ref[...]

    # Dropout: identity in eval mode.
    # TODO(synk): training-mode dropout (attn-weight + output) not implemented.

    # --- residual + LayerNorm (f32; eps matches PyTorch default 1e-5).
    y = xq_f32 + attn
    mean = jnp.mean(y, axis=-1, keepdims=True)
    var = jnp.mean(jnp.square(y - mean), axis=-1, keepdims=True)
    y = (y - mean) * jax.lax.rsqrt(var + _LN_EPS)
    o_ref[...] = (y * gamma_ref[...] + beta_ref[...]).astype(o_ref.dtype)


# --------------------------------------------------------------------------- #
# Parameter packing (one-time; do NOT call per forward step)
# --------------------------------------------------------------------------- #
def prepare_params(params, num_heads):
    """Transpose to x @ W layout, fold 1/sqrt(head_dim) into the Q projection,
    and store matmul weights in bf16 (halves weight DMA + VMEM)."""
    E = params["out_proj_weight"].shape[0]
    assert E % num_heads == 0, "embed_dim must be divisible by num_heads"
    head_dim = E // num_heads
    scale = 1.0 / math.sqrt(head_dim)
    w_in = params["in_proj_weight"]          # (3E, E): torch computes x @ W.T
    b_in = params["in_proj_bias"]            # (3E,)
    return {
        "wq": (w_in[:E].T * scale).astype(jnp.bfloat16),
        "wk": w_in[E:2 * E].T.astype(jnp.bfloat16),
        "wv": w_in[2 * E:].T.astype(jnp.bfloat16),
        "bq": (b_in[:E] * scale).reshape(1, E).astype(jnp.float32),
        "bk": b_in[E:2 * E].reshape(1, E).astype(jnp.float32),
        "bv": b_in[2 * E:].reshape(1, E).astype(jnp.float32),
        "wout": params["out_proj_weight"].T.astype(jnp.bfloat16),
        "bout": params["out_proj_bias"].reshape(1, E).astype(jnp.float32),
        "gamma": params["ln_weight"].reshape(1, E).astype(jnp.float32),
        "beta": params["ln_bias"].reshape(1, E).astype(jnp.float32),
    }


# --------------------------------------------------------------------------- #
# VMEM-aware tiling
# --------------------------------------------------------------------------- #
def _vmem_capacity_bytes():
    # Hardware probe only (never wraps the pallas_call build, so lowering
    # errors are not masked). Falls back to the smallest per-core VMEM among
    # supported generations (v7x: 64 MiB), which is safe everywhere.
    try:
        return int(pltpu.get_tpu_info().vmem_capacity_bytes)
    except Exception:  # hw probe only
        return 64 * 1024 * 1024


def _estimate_vmem_bytes(Tq, S, E, H):
    score = H * Tq * S
    s_f32 = score * 4                      # scores
    p_f32 = score * 4                      # exp(scores)
    p_bf16 = score * 2                     # bf16 copy fed to the MXU
    kv_scratch = 2 * S * E * 2             # (H,S,Dh) bf16 x2
    kv_f32 = 2 * S * E * 4                 # k/v f32 intermediates at qi==0
    weights = 4 * E * E * 2 + 6 * E * 4    # bf16 weights + f32 bias/LN vectors
    xkv = 2 * S * E * 4                    # xkv block (double-buffered, f32)
    tiles = 2 * Tq * E * 4 * 2 + 3 * Tq * E * 4   # xq/out blocks + q/attn temps
    return s_f32 + p_f32 + p_bf16 + kv_scratch + kv_f32 + weights + xkv + tiles


def _select_q_tile(S, E, H, vmem_cap):
    """Largest query tile whose footprint fits comfortably in this chip's VMEM
    (naturally picks ~128 on v7x and 256+ on v5e/v6e for ViT-scale shapes)."""
    budget = int(vmem_cap * 0.6)
    divisors = [t for t in (512, 256, 128, 64) if t <= S and S % t == 0]
    for t in divisors:
        if _estimate_vmem_bytes(t, S, E, H) <= budget:
            return t
    if divisors:
        return divisors[-1]
    return S


# --------------------------------------------------------------------------- #
# pallas_call wrapper
# --------------------------------------------------------------------------- #
def _const_spec(shape):
    # Constant operands (index_map never changes): single-buffer them so the
    # weights are not double-buffered in VMEM.
    index_map = lambda b, qi: (0,) * len(shape)
    if _HAS_BUFFERED:
        return pl.BlockSpec(shape, index_map, pipeline_mode=pl.Buffered(buffer_count=1))
    return pl.BlockSpec(shape, index_map)


def _build_pallas_call(B, S, E, Tq, num_q_tiles, num_heads, head_dim,
                       out_dtype, vmem_limit_bytes):
    kernel = functools.partial(mhsa_kernel, num_heads=num_heads, head_dim=head_dim)
    return pl.pallas_call(
        kernel,
        out_shape=jax.ShapeDtypeStruct((B, S, E), out_dtype),
        grid=(B, num_q_tiles),
        in_specs=[
            pl.BlockSpec((None, Tq, E), lambda b, qi: (b, qi, 0)),  # x: query tile
            pl.BlockSpec((None, S, E), lambda b, qi: (b, 0, 0)),    # x: K/V source (re-DMA'd only when b changes)
            _const_spec((E, E)),   # W_q (scale folded)
            _const_spec((E, E)),   # W_k
            _const_spec((E, E)),   # W_v
            _const_spec((1, E)),   # b_q (scale folded)
            _const_spec((1, E)),   # b_k
            _const_spec((1, E)),   # b_v
            _const_spec((E, E)),   # W_out
            _const_spec((1, E)),   # b_out
            _const_spec((1, E)),   # ln gamma
            _const_spec((1, E)),   # ln beta
        ],
        out_specs=pl.BlockSpec((None, Tq, E), lambda b, qi: (b, qi, 0)),
        scratch_shapes=[
            pltpu.VMEM((num_heads, S, head_dim), jnp.bfloat16),  # K cache (head-major)
            pltpu.VMEM((num_heads, S, head_dim), jnp.bfloat16),  # V cache (head-major)
        ],
        compiler_params=pltpu.CompilerParams(
            # B parallel (2 TensorCores on v7x); qi arbitrary because the K/V
            # scratch is carried across query tiles of the same batch element.
            dimension_semantics=("parallel", "arbitrary"),
            vmem_limit_bytes=vmem_limit_bytes),
    )


def mhsa_forward(x, prepared, num_heads, q_tile=None, activations_bf16=False):
    """Fused MHSA + residual + LayerNorm forward. x: (B, S, E).

    activations_bf16: cast the activation input to bf16 at the pallas_call
    boundary (halves activation DMA / xkv footprint; mainly useful on v5e).
    Residual/LayerNorm math stays f32 inside the kernel; output keeps x.dtype.
    """
    B, S, E = x.shape
    assert E % num_heads == 0, "embed_dim must be divisible by num_heads"
    head_dim = E // num_heads

    vmem_cap = _vmem_capacity_bytes()
    if q_tile is None:
        Tq = _select_q_tile(S, E, num_heads, vmem_cap)
    else:
        Tq = q_tile if (q_tile <= S and S % q_tile == 0) else S
    num_q_tiles = S // Tq

    # Leave headroom below physical VMEM for Mosaic internal scratch, DMA
    # descriptors and spill (~54 MiB on v7x, ~108 MiB on v5e/v6e).
    vmem_limit = int(vmem_cap * 0.85)

    x_in = x.astype(jnp.bfloat16) if activations_bf16 else x
    call = _build_pallas_call(B, S, E, Tq, num_q_tiles, num_heads, head_dim,
                              x.dtype, vmem_limit)
    return call(x_in, x_in,
                prepared["wq"], prepared["wk"], prepared["wv"],
                prepared["bq"], prepared["bk"], prepared["bv"],
                prepared["wout"], prepared["bout"],
                prepared["gamma"], prepared["beta"])


# --------------------------------------------------------------------------- #
# Reference + demo
# --------------------------------------------------------------------------- #
def init_params(key, embed_dim):
    k1, k2 = jax.random.split(key, 2)
    scale = 0.02
    return {
        "in_proj_weight": scale * jax.random.normal(k1, (3 * embed_dim, embed_dim), jnp.float32),
        "in_proj_bias": jnp.zeros((3 * embed_dim,), jnp.float32),
        "out_proj_weight": scale * jax.random.normal(k2, (embed_dim, embed_dim), jnp.float32),
        "out_proj_bias": jnp.zeros((embed_dim,), jnp.float32),
        "ln_weight": jnp.ones((embed_dim,), jnp.float32),
        "ln_bias": jnp.zeros((embed_dim,), jnp.float32),
    }


def mhsa_reference(x, params, num_heads):
    """Pure-JAX f32 reference matching PyTorch MHA (eval mode) + residual + LN."""
    B, S, E = x.shape
    Dh = E // num_heads
    w_in, b_in = params["in_proj_weight"], params["in_proj_bias"]
    q = x @ w_in[:E].T + b_in[:E]
    k = x @ w_in[E:2 * E].T + b_in[E:2 * E]
    v = x @ w_in[2 * E:].T + b_in[2 * E:]

    def split(t):
        return t.reshape(B, S, num_heads, Dh).transpose(0, 2, 1, 3)

    qh, kh, vh = split(q), split(k), split(v)
    s = jnp.einsum('bhqd,bhkd->bhqk', qh, kh) * (1.0 / math.sqrt(Dh))
    p = jax.nn.softmax(s, axis=-1)
    ctx = jnp.einsum('bhqk,bhkd->bhqd', p, vh).transpose(0, 2, 1, 3).reshape(B, S, E)
    attn = ctx @ params["out_proj_weight"].T + params["out_proj_bias"]
    y = x + attn
    mean = y.mean(-1, keepdims=True)
    var = ((y - mean) ** 2).mean(-1, keepdims=True)
    return (y - mean) / jnp.sqrt(var + _LN_EPS) * params["ln_weight"] + params["ln_bias"]


if __name__ == "__main__":
    B, S, E, H = 2, 8, 32, 4

    key = jax.random.PRNGKey(0)
    kx, kp = jax.random.split(key)
    x = jax.random.normal(kx, (B, S, E), jnp.float32)
    params = init_params(kp, E)
    prepared = prepare_params(params, num_heads=H)   # one-time weight packing

    out = mhsa_forward(x, prepared, num_heads=H)
    out = jax.block_until_ready(out)
    assert out.shape == (B, S, E)

    ref = mhsa_reference(x, params, num_heads=H)
    # bf16 matmuls + approx reciprocal vs f32 reference -> loose tolerance.
    assert jnp.allclose(out, ref, atol=5e-2, rtol=5e-2), "parity check failed"

    print("KERNEL_OK")
</pallas_src>

<mosaic_0001>
module attributes {stable_mosaic.version = 11 : i64} {
  func.func @mhsa_kernel(%arg0: i32, %arg1: i32, %arg2: memref<1x8x32xf32, #tpu.memory_space<vmem>>, %arg3: memref<1x8x32xf32, #tpu.memory_space<vmem>>, %arg4: memref<32x32xbf16, #tpu.memory_space<vmem>>, %arg5: memref<32x32xbf16, #tpu.memory_space<vmem>>, %arg6: memref<32x32xbf16, #tpu.memory_space<vmem>>, %arg7: memref<1x32xf32, #tpu.memory_space<vmem>>, %arg8: memref<1x32xf32, #tpu.memory_space<vmem>>, %arg9: memref<1x32xf32, #tpu.memory_space<vmem>>, %arg10: memref<32x32xbf16, #tpu.memory_space<vmem>>, %arg11: memref<1x32xf32, #tpu.memory_space<vmem>>, %arg12: memref<1x32xf32, #tpu.memory_space<vmem>>, %arg13: memref<1x32xf32, #tpu.memory_space<vmem>>, %arg14: memref<1x8x32xf32, #tpu.memory_space<vmem>>, %arg15: memref<4x8x8xbf16, #tpu.memory_space<vmem>>, %arg16: memref<4x8x8xbf16, #tpu.memory_space<vmem>>) attributes {dimension_semantics = [#tpu.dimension_semantics<parallel>, #tpu.dimension_semantics<arbitrary>], iteration_bounds = array<i64: 2, 1>, scalar_prefetch = 0 : i64, scratch_operands = 2 : i64, tpu.core_type = #tpu.core_type<tc>, window_params = [{transform_indices = @transform_0, window_bounds = array<i64: 1, 8, 32>}, {transform_indices = @transform_1, window_bounds = array<i64: 1, 8, 32>}, {pipeline_mode = #tpu.pipeline_mode<synchronous>, transform_indices = @transform_2, window_bounds = array<i64: 32, 32>}, {pipeline_mode = #tpu.pipeline_mode<synchronous>, transform_indices = @transform_3, window_bounds = array<i64: 32, 32>}, {pipeline_mode = #tpu.pipeline_mode<synchronous>, transform_indices = @transform_4, window_bounds = array<i64: 32, 32>}, {pipeline_mode = #tpu.pipeline_mode<synchronous>, transform_indices = @transform_5, window_bounds = array<i64: 1, 32>}, {pipeline_mode = #tpu.pipeline_mode<synchronous>, transform_indices = @transform_6, window_bounds = array<i64: 1, 32>}, {pipeline_mode = #tpu.pipeline_mode<synchronous>, transform_indices = @transform_7, window_bounds = array<i64: 1, 32>}, {pipeline_mode = #tpu.pipeline_mode<synchronous>, transform_indices = @transform_8, window_bounds = array<i64: 32, 32>}, {pipeline_mode = #tpu.pipeline_mode<synchronous>, transform_indices = @transform_9, window_bounds = array<i64: 1, 32>}, {pipeline_mode = #tpu.pipeline_mode<synchronous>, transform_indices = @transform_10, window_bounds = array<i64: 1, 32>}, {pipeline_mode = #tpu.pipeline_mode<synchronous>, transform_indices = @transform_11, window_bounds = array<i64: 1, 32>}, {transform_indices = @transform_12, window_bounds = array<i64: 1, 8, 32>}]} {
    %c0_i32 = arith.constant 0 : i32
    %0 = arith.cmpi eq, %arg1, %c0_i32 : i32
    %1 = arith.extui %0 : i1 to i32
    %c0_i32_0 = arith.constant 0 : i32
    %2 = arith.cmpi ne, %1, %c0_i32_0 : i32
    scf.if %2 {
      %c0_34 = arith.constant 0 : index
      %c0_35 = arith.constant 0 : index
      %c0_36 = arith.constant 0 : index
      %65 = vector.load %arg3[%c0_34, %c0_35, %c0_36] : memref<1x8x32xf32, #tpu.memory_space<vmem>>, vector<1x8x32xf32>
      %66 = vector.shape_cast %65 : vector<1x8x32xf32> to vector<8x32xf32>
      %67 = arith.truncf %66 : vector<8x32xf32> to vector<8x32xbf16>
      %c0_37 = arith.constant 0 : index
      %c0_38 = arith.constant 0 : index
      %68 = vector.load %arg5[%c0_37, %c0_38] : memref<32x32xbf16, #tpu.memory_space<vmem>>, vector<32x32xbf16>
      %cst_39 = arith.constant dense<0.000000e+00> : vector<8x32xf32>
      %69 = tpu.matmul %67, %68, %cst_39 {dimension_numbers = #tpu.dot_dimension_numbers<[1], [0], [0], [1], [0, 0, 1, 1], [], []>} : vector<8x32xbf16>, vector<32x32xbf16>, vector<8x32xf32> -> vector<8x32xf32>
      %c0_40 = arith.constant 0 : index
      %c0_41 = arith.constant 0 : index
      %70 = vector.load %arg8[%c0_40, %c0_41] : memref<1x32xf32, #tpu.memory_space<vmem>>, vector<1x32xf32>
      %71 = vector.broadcast %70 : vector<1x32xf32> to vector<8x32xf32>
      %72 = arith.addf %69, %71 : vector<8x32xf32>
      %c0_42 = arith.constant 0 : index
      %c0_43 = arith.constant 0 : index
      %73 = vector.load %arg6[%c0_42, %c0_43] : memref<32x32xbf16, #tpu.memory_space<vmem>>, vector<32x32xbf16>
      %cst_44 = arith.constant dense<0.000000e+00> : vector<8x32xf32>
      %74 = tpu.matmul %67, %73, %cst_44 {dimension_numbers = #tpu.dot_dimension_numbers<[1], [0], [0], [1], [0, 0, 1, 1], [], []>} : vector<8x32xbf16>, vector<32x32xbf16>, vector<8x32xf32> -> vector<8x32xf32>
      %c0_45 = arith.constant 0 : index
      %c0_46 = arith.constant 0 : index
      %75 = vector.load %arg9[%c0_45, %c0_46] : memref<1x32xf32, #tpu.memory_space<vmem>>, vector<1x32xf32>
      %76 = vector.broadcast %75 : vector<1x32xf32> to vector<8x32xf32>
      %77 = arith.addf %74, %76 : vector<8x32xf32>
      %78 = vector.shape_cast %72 : vector<8x32xf32> to vector<8x4x8xf32>
      %79 = tpu.transpose %78, [1, 0, 2] : vector<8x4x8xf32> -> vector<4x8x8xf32>
      %80 = arith.truncf %79 : vector<4x8x8xf32> to vector<4x8x8xbf16>
      %c0_47 = arith.constant 0 : index
      %c0_48 = arith.constant 0 : index
      %c0_49 = arith.constant 0 : index
      %81 = vector.load %arg15[%c0_47, %c0_48, %c0_49] : memref<4x8x8xbf16, #tpu.memory_space<vmem>>, vector<4x8x8xbf16>
      tpu.vector_store %arg15[%c0_47, %c0_48, %c0_49], %80 {strides = array<i32>} : memref<4x8x8xbf16, #tpu.memory_space<vmem>>, vector<4x8x8xbf16>,
      %82 = vector.shape_cast %77 : vector<8x32xf32> to vector<8x4x8xf32>
      %83 = tpu.transpose %82, [1, 0, 2] : vector<8x4x8xf32> -> vector<4x8x8xf32>
      %84 = arith.truncf %83 : vector<4x8x8xf32> to vector<4x8x8xbf16>
      %c0_50 = arith.constant 0 : index
      %c0_51 = arith.constant 0 : index
      %c0_52 = arith.constant 0 : index
      %85 = vector.load %arg16[%c0_50, %c0_51, %c0_52] : memref<4x8x8xbf16, #tpu.memory_space<vmem>>, vector<4x8x8xbf16>
      tpu.vector_store %arg16[%c0_50, %c0_51, %c0_52], %84 {strides = array<i32>} : memref<4x8x8xbf16, #tpu.memory_space<vmem>>, vector<4x8x8xbf16>,
    } else {
    }
    %c0 = arith.constant 0 : index
    %c0_1 = arith.constant 0 : index
    %c0_2 = arith.constant 0 : index
    %3 = vector.load %arg2[%c0, %c0_1, %c0_2] : memref<1x8x32xf32, #tpu.memory_space<vmem>>, vector<1x8x32xf32>
    %4 = vector.shape_cast %3 : vector<1x8x32xf32> to vector<8x32xf32>
    %5 = arith.truncf %4 : vector<8x32xf32> to vector<8x32xbf16>
    %c0_3 = arith.constant 0 : index
    %c0_4 = arith.constant 0 : index
    %6 = vector.load %arg4[%c0_3, %c0_4] : memref<32x32xbf16, #tpu.memory_space<vmem>>, vector<32x32xbf16>
    %cst = arith.constant dense<0.000000e+00> : vector<8x32xf32>
    %7 = tpu.matmul %5, %6, %cst {dimension_numbers = #tpu.dot_dimension_numbers<[1], [0], [0], [1], [0, 0, 1, 1], [], []>} : vector<8x32xbf16>, vector<32x32xbf16>, vector<8x32xf32> -> vector<8x32xf32>
    %c0_5 = arith.constant 0 : index
    %c0_6 = arith.constant 0 : index
    %8 = vector.load %arg7[%c0_5, %c0_6] : memref<1x32xf32, #tpu.memory_space<vmem>>, vector<1x32xf32>
    %9 = vector.broadcast %8 : vector<1x32xf32> to vector<8x32xf32>
    %10 = arith.addf %7, %9 : vector<8x32xf32>
    %11 = vector.shape_cast %10 : vector<8x32xf32> to vector<8x4x8xf32>
    %12 = tpu.transpose %11, [1, 0, 2] : vector<8x4x8xf32> -> vector<4x8x8xf32>
    %13 = arith.truncf %12 : vector<4x8x8xf32> to vector<4x8x8xbf16>
    %c0_7 = arith.constant 0 : index
    %c0_8 = arith.constant 0 : index
    %c0_9 = arith.constant 0 : index
    %14 = vector.load %arg15[%c0_7, %c0_8, %c0_9] : memref<4x8x8xbf16, #tpu.memory_space<vmem>>, vector<4x8x8xbf16>
    "tpu.trace_start"() <{level = 10 : i32, message = "hqd,hkd->hqk"}> : () -> ()
    %cst_10 = arith.constant dense<0.000000e+00> : vector<4x8x8xf32>
    %15 = tpu.matmul %13, %14, %cst_10 {dimension_numbers = #tpu.dot_dimension_numbers<[2], [2], [1], [1], [0, 0, 0, 1, 1, 1], [0], [0]>} : vector<4x8x8xbf16>, vector<4x8x8xbf16>, vector<4x8x8xf32> -> vector<4x8x8xf32>
    "tpu.trace_stop"() : () -> ()
    %cst_11 = arith.constant dense<0xFF800000> : vector<4x8xf32>
    %16 = vector.multi_reduction <maximumf>, %15, %cst_11 [2] : vector<4x8x8xf32> to vector<4x8xf32>
    %17 = vector.shape_cast %16 : vector<4x8xf32> to vector<4x8x1xf32>
    %18 = vector.broadcast %17 : vector<4x8x1xf32> to vector<4x8x8xf32>
    %19 = arith.subf %15, %18 : vector<4x8x8xf32>
    %20 = math.exp %19 : vector<4x8x8xf32>
    %cst_12 = arith.constant dense<0.000000e+00> : vector<4x8xf32>
    %21 = vector.multi_reduction <add>, %20, %cst_12 [2] : vector<4x8x8xf32> to vector<4x8xf32>
    %22 = vector.shape_cast %21 : vector<4x8xf32> to vector<4x8x1xf32>
    %23 = arith.truncf %20 : vector<4x8x8xf32> to vector<4x8x8xbf16>
    %c0_13 = arith.constant 0 : index
    %c0_14 = arith.constant 0 : index
    %c0_15 = arith.constant 0 : index
    %24 = vector.load %arg16[%c0_13, %c0_14, %c0_15] : memref<4x8x8xbf16, #tpu.memory_space<vmem>>, vector<4x8x8xbf16>
    "tpu.trace_start"() <{level = 10 : i32, message = "hqk,hkd->hqd"}> : () -> ()
    %cst_16 = arith.constant dense<0.000000e+00> : vector<4x8x8xf32>
    %25 = tpu.matmul %23, %24, %cst_16 {dimension_numbers = #tpu.dot_dimension_numbers<[2], [1], [1], [2], [0, 0, 0, 1, 1, 2], [0], [0]>} : vector<4x8x8xbf16>, vector<4x8x8xbf16>, vector<4x8x8xf32> -> vector<4x8x8xf32>
    "tpu.trace_stop"() : () -> ()
    %26 = tpu.reciprocal %22 {approx = true} : vector<4x8x1xf32> -> vector<4x8x1xf32>
    %27 = vector.broadcast %26 : vector<4x8x1xf32> to vector<4x8x8xf32>
    %28 = arith.mulf %25, %27 : vector<4x8x8xf32>
    %29 = tpu.transpose %28, [1, 0, 2] : vector<4x8x8xf32> -> vector<8x4x8xf32>
    %30 = vector.shape_cast %29 : vector<8x4x8xf32> to vector<8x32xf32>
    %31 = arith.truncf %30 : vector<8x32xf32> to vector<8x32xbf16>
    %c0_17 = arith.constant 0 : index
    %c0_18 = arith.constant 0 : index
    %32 = vector.load %arg10[%c0_17, %c0_18] : memref<32x32xbf16, #tpu.memory_space<vmem>>, vector<32x32xbf16>
    %cst_19 = arith.constant dense<0.000000e+00> : vector<8x32xf32>
    %33 = tpu.matmul %31, %32, %cst_19 {dimension_numbers = #tpu.dot_dimension_numbers<[1], [0], [0], [1], [0, 0, 1, 1], [], []>} : vector<8x32xbf16>, vector<32x32xbf16>, vector<8x32xf32> -> vector<8x32xf32>
    %c0_20 = arith.constant 0 : index
    %c0_21 = arith.constant 0 : index
    %34 = vector.load %arg11[%c0_20, %c0_21] : memref<1x32xf32, #tpu.memory_space<vmem>>, vector<1x32xf32>
    %35 = vector.broadcast %34 : vector<1x32xf32> to vector<8x32xf32>
    %36 = arith.addf %33, %35 : vector<8x32xf32>
    %37 = arith.addf %4, %36 : vector<8x32xf32>
    %cst_22 = arith.constant dense<0.000000e+00> : vector<8xf32>
    %38 = vector.multi_reduction <add>, %37, %cst_22 [1] : vector<8x32xf32> to vector<8xf32>
    %39 = vector.shape_cast %38 : vector<8xf32> to vector<8x1xf32>
    %cst_23 = arith.constant 3.200000e+01 : f32
    %40 = vector.broadcast %cst_23 : f32 to vector<8x1xf32>
    %41 = arith.divf %39, %40 : vector<8x1xf32>
    %42 = vector.broadcast %41 : vector<8x1xf32> to vector<8x32xf32>
    %43 = arith.subf %37, %42 : vector<8x32xf32>
    %44 = arith.mulf %43, %43 : vector<8x32xf32>
    %cst_24 = arith.constant dense<0.000000e+00> : vector<8xf32>
    %45 = vector.multi_reduction <add>, %44, %cst_24 [1] : vector<8x32xf32> to vector<8xf32>
    %46 = vector.shape_cast %45 : vector<8xf32> to vector<8x1xf32>
    %cst_25 = arith.constant 3.200000e+01 : f32
    %47 = vector.broadcast %cst_25 : f32 to vector<8x1xf32>
    %48 = arith.divf %46, %47 : vector<8x1xf32>
    %49 = vector.broadcast %41 : vector<8x1xf32> to vector<8x32xf32>
    %50 = arith.subf %37, %49 : vector<8x32xf32>
    %cst_26 = arith.constant 9.99999974E-6 : f32
    %51 = vector.broadcast %cst_26 : f32 to vector<8x1xf32>
    %52 = arith.addf %48, %51 : vector<8x1xf32>
    %53 = math.rsqrt %52 : vector<8x1xf32>
    %54 = vector.broadcast %53 : vector<8x1xf32> to vector<8x32xf32>
    %55 = arith.mulf %50, %54 : vector<8x32xf32>
    %c0_27 = arith.constant 0 : index
    %c0_28 = arith.constant 0 : index
    %56 = vector.load %arg12[%c0_27, %c0_28] : memref<1x32xf32, #tpu.memory_space<vmem>>, vector<1x32xf32>
    %57 = vector.broadcast %56 : vector<1x32xf32> to vector<8x32xf32>
    %58 = arith.mulf %55, %57 : vector<8x32xf32>
    %c0_29 = arith.constant 0 : index
    %c0_30 = arith.constant 0 : index
    %59 = vector.load %arg13[%c0_29, %c0_30] : memref<1x32xf32, #tpu.memory_space<vmem>>, vector<1x32xf32>
    %60 = vector.broadcast %59 : vector<1x32xf32> to vector<8x32xf32>
    %61 = arith.addf %58, %60 : vector<8x32xf32>
    %c0_31 = arith.constant 0 : index
    %c0_32 = arith.constant 0 : index
    %c0_33 = arith.constant 0 : index
    %62 = vector.load %arg14[%c0_31, %c0_32, %c0_33] : memref<1x8x32xf32, #tpu.memory_space<vmem>>, vector<1x8x32xf32>
    %63 = vector.shape_cast %62 : vector<1x8x32xf32> to vector<8x32xf32>
    %64 = vector.shape_cast %61 : vector<8x32xf32> to vector<1x8x32xf32>
    tpu.vector_store %arg14[%c0_31, %c0_32, %c0_33], %64 {strides = array<i32>} : memref<1x8x32xf32, #tpu.memory_space<vmem>>, vector<1x8x32xf32>,
    return
  }
  func.func @transform_0(%arg0: i32, %arg1: i32) -> (i32, i32, i32) {
    %c0_i32 = arith.constant 0 : i32
    %c0_i32_0 = arith.constant 0 : i32
    return %arg0, %arg1, %c0_i32 : i32, i32, i32
  }
  func.func @transform_1(%arg0: i32, %arg1: i32) -> (i32, i32, i32) {
    %c0_i32 = arith.constant 0 : i32
    %c0_i32_0 = arith.constant 0 : i32
    %c0_i32_1 = arith.constant 0 : i32
    return %arg0, %c0_i32, %c0_i32_0 : i32, i32, i32
  }
  func.func @transform_2(%arg0: i32, %arg1: i32) -> (i32, i32) {
    %c0_i32 = arith.constant 0 : i32
    %c0_i32_0 = arith.constant 0 : i32
    %c0_i32_1 = arith.constant 0 : i32
    return %c0_i32, %c0_i32_0 : i32, i32
  }
  func.func @transform_3(%arg0: i32, %arg1: i32) -> (i32, i32) {
    %c0_i32 = arith.constant 0 : i32
    %c0_i32_0 = arith.constant 0 : i32
    %c0_i32_1 = arith.constant 0 : i32
    return %c0_i32, %c0_i32_0 : i32, i32
  }
  func.func @transform_4(%arg0: i32, %arg1: i32) -> (i32, i32) {
    %c0_i32 = arith.constant 0 : i32
    %c0_i32_0 = arith.constant 0 : i32
    %c0_i32_1 = arith.constant 0 : i32
    return %c0_i32, %c0_i32_0 : i32, i32
  }
  func.func @transform_5(%arg0: i32, %arg1: i32) -> (i32, i32) {
    %c0_i32 = arith.constant 0 : i32
    %c0_i32_0 = arith.constant 0 : i32
    %c0_i32_1 = arith.constant 0 : i32
    return %c0_i32, %c0_i32_0 : i32, i32
  }
  func.func @transform_6(%arg0: i32, %arg1: i32) -> (i32, i32) {
    %c0_i32 = arith.constant 0 : i32
    %c0_i32_0 = arith.constant 0 : i32
    %c0_i32_1 = arith.constant 0 : i32
    return %c0_i32, %c0_i32_0 : i32, i32
  }
  func.func @transform_7(%arg0: i32, %arg1: i32) -> (i32, i32) {
    %c0_i32 = arith.constant 0 : i32
    %c0_i32_0 = arith.constant 0 : i32
    %c0_i32_1 = arith.constant 0 : i32
    return %c0_i32, %c0_i32_0 : i32, i32
  }
  func.func @transform_8(%arg0: i32, %arg1: i32) -> (i32, i32) {
    %c0_i32 = arith.constant 0 : i32
    %c0_i32_0 = arith.constant 0 : i32
    %c0_i32_1 = arith.constant 0 : i32
    return %c0_i32, %c0_i32_0 : i32, i32
  }
  func.func @transform_9(%arg0: i32, %arg1: i32) -> (i32, i32) {
    %c0_i32 = arith.constant 0 : i32
    %c0_i32_0 = arith.constant 0 : i32
    %c0_i32_1 = arith.constant 0 : i32
    return %c0_i32, %c0_i32_0 : i32, i32
  }
  func.func @transform_10(%arg0: i32, %arg1: i32) -> (i32, i32) {
    %c0_i32 = arith.constant 0 : i32
    %c0_i32_0 = arith.constant 0 : i32
    %c0_i32_1 = arith.constant 0 : i32
    return %c0_i32, %c0_i32_0 : i32, i32
  }
  func.func @transform_11(%arg0: i32, %arg1: i32) -> (i32, i32) {
    %c0_i32 = arith.constant 0 : i32
    %c0_i32_0 = arith.constant 0 : i32
    %c0_i32_1 = arith.constant 0 : i32
    return %c0_i32, %c0_i32_0 : i32, i32
  }
  func.func @transform_12(%arg0: i32, %arg1: i32) -> (i32, i32, i32) {
    %c0_i32 = arith.constant 0 : i32
    %c0_i32_0 = arith.constant 0 : i32
    return %arg0, %arg1, %c0_i32 : i32, i32, i32
  }
}

</mosaic_0001>

<bundles_post_ra>
// kernel: tpu_custom_call.1
= control target key start
LH: loop header
LB: loop body
LE: loop exit
PB: predicated region body
PF: predicated region fallthrough
CT: control target
= control target key end

     0   :  { %s2622_s0 = inlined_call_operand.hbm [shape: f32[2,8,32], index: 0, kind: input, shape index: {}]   ;;  %s2623_s1 = inlined_call_operand.hbm [shape: f32[2,8,32], index: 1, kind: input, shape index: {}]   ;;  %s2624_s2 = inlined_call_operand.hbm [shape: bf16[32,32], index: 2, kind: input, shape index: {}]   ;;  %s2625_s3 = inlined_call_operand.hbm [shape: bf16[32,32], index: 3, kind: input, shape index: {}]   ;;  %s2626_s4 = inlined_call_operand.hbm [shape: bf16[32,32], index: 4, kind: input, shape index: {}]   ;;  %s2627_s5 = inlined_call_operand.vmem [shape: f32[1,32], index: 5, kind: input, shape index: {}]   ;;  %s2628_s6 = inlined_call_operand.vmem [shape: f32[1,32], index: 6, kind: input, shape index: {}]   ;;  %s2629_s7 = inlined_call_operand.vmem [shape: f32[1,32], index: 7, kind: input, shape index: {}]   ;;  %s2630_s8 = inlined_call_operand.hbm [shape: bf16[32,32], index: 8, kind: input, shape index: {}]   ;;  %s2631_s9 = inlined_call_operand.vmem [shape: f32[1,32], index: 9, kind: input, shape index: {}]   ;;  %s2632_s10 = inlined_call_operand.vmem [shape: f32[1,32], index: 10, kind: input, shape index: {}]   ;;  %s2633_s11 = inlined_call_operand.vmem [shape: f32[1,32], index: 11, kind: input, shape index: {}]   ;;  %s2634_s12 = inlined_call_operand.hbm [shape: f32[2,8,32], index: 12, kind: output, shape index: {}]  }
   0x1   :  { %2643 = sst [smem:[#allocation29_spill]] %s2624_s2 }
   0x2   :  { %2644 = sst [smem:[#allocation30_spill]] %s2625_s3 }
   0x3   :  { %2645 = sst [smem:[#allocation31_spill]] %s2626_s4 }
   0x4   :  { %2646 = sst [smem:[#allocation32_spill]] %s2630_s8 }
   0x5   :  { %2647 = sst [smem:[#allocation33_spill]] %s2633_s11 }
   0x6   :  { %2648 = sst [smem:[#allocation34_spill]] %s2634_s12 }
   0x7   :  { %17 = vsyncpa [#allocation5], 0 }
   0x8   :  { %19 = vsyncpa [#allocation5 + $0x1], 0 }
   0x9   :  { %20 = vsyncpa [#allocation8], 0 }
   0xa   :  { %22 = vsyncpa [#allocation8 + $0x1], 0 }
   0xb   :  { %23 = vsyncpa [#allocation11], 0 }
   0xc   :  { %24 = vsyncpa [#allocation14], 0 }
   0xd   :  { %25 = vsyncpa [#allocation6], 0 }
   0xe   :  { %27 = vsyncpa [#allocation6 + $0x1], 0  ;;  %s2206_s21 = smov 0   ;;  %s2208_s22 = smov 0  }
   0xf   :  { %s2210_s23 = smov 0   ;;  %s2212_s24 = smov 0  }
  0x10   :  { %s2214_s25 = smov 0   ;;  %s2216_s26 = smov 0  }
  0x11 LB: > { %2649 = sst [smem:[#allocation22_spill]] %s2104_s21  ;;  %s2237_s27 = sadd.s32 4294967295, %s2124_s26   ;;  %s2124_s26 = sphi %s2216_s26, %s33_s26   ;;  %s2120_s25 = sphi %s2214_s25, %s2674_s25   ;;  %s2116_s24 = sphi %s2212_s24, %s2673_s24   ;;  %s2112_s23 = sphi %s2210_s23, %s2672_s23   ;;  %s2108_s22 = sphi %s2208_s22, %s2676_s22   ;;  %s2104_s21 = sphi %s2206_s21, %s2675_s21  }
  0x12   : > { %2650 = sst [smem:[#allocation23_spill]] %s2112_s23  ;;  %p1627_p0 = scmp.ge.s32.totalorder %s2124_s26, 1 }
  0x13   : > { %2651 = sst [smem:[#allocation24_spill]] %s2120_s25  ;;  %p68_p1 = scmp.eq.s32.totalorder %s2237_s27, 0 }
  0x14   : > { %p342_p2 = scmp.lt.s32.totalorder %s2124_s26, 3  ;;  %s2652_s2 = sld [smem:[#allocation29_spill]] }
  0x15   : > { %s2126_s14 = smov [#allocation9]   ;;  %p1632_p6 = scmp.ge.s32.totalorder %s2124_s26, 2 }
  0x16   : > { %p2245_p3 = pnand %p1627_p0, %p342_p2  ;;  %s355_s15 = sshll.u32 %s2126_s14, 4  ;;  %s356_s15 = int_to_ptr.vmem [resolvable:$true] %s355_s15 }
  0x17   : > { %s2655_s3 = sld [smem:[#allocation30_spill]]  ;;  %s2127_s20 = smov 64  }
  0x18   : > { %p1723_p4 = pneg %p2245_p3  ;;  %s2128_s28 = smov 4  }
  0x19   : > { %s2129_s29 = smov [#allocation10]   ;;  %s2656_s4 = sld [smem:[#allocation31_spill]] }
  0x1a   : > { %s353_s30 = sshll.u32 %s2652_s2, 4  ;;  %p2253_p5 = pnand %p1723_p4, %p68_p1  ;;  %s354_s30 = int_to_ptr.hbm [resolvable:$true] %s353_s30 }
  0x1b   : > { %s369_s14 = sshll.u32 %s2129_s29, 4  ;;  %s2657_s8 = sld [smem:[#allocation32_spill]]  ;;  %s370_s14 = int_to_ptr.vmem [resolvable:$true] %s369_s14 }
  0x1c   : > { %1726 = dma.hbm_to_vmem [thread:$0]  (!%p2253_p5), %s354_s30, 256, %s356_s15, [#allocation8], %s2127_s20, %s2127_s20, %s2128_s28  }
  0x1d   : > { %s367_s19 = sshll.u32 %s2655_s3, 4  ;;  %s2130_s15 = smov [#allocation12]   ;;  %s368_s19 = int_to_ptr.hbm [resolvable:$true] %s367_s19 }
  0x1e   : > { %1729 = dma.hbm_to_vmem [thread:$0]  (!%p2253_p5), %s368_s19, 256, %s370_s14, [#allocation11], %s2127_s20, %s2127_s20, %s2128_s28  }
  0x1f   : > { %s381_s12 = sshll.u32 %s2656_s4, 4  ;;  %s383_s3 = sshll.u32 %s2130_s15, 4  ;;  %s382_s12 = int_to_ptr.hbm [resolvable:$true] %s381_s12  ;;  %s384_s3 = int_to_ptr.vmem [resolvable:$true] %s383_s3 }
  0x20   : > { %1732 = dma.hbm_to_vmem [thread:$0]  (!%p2253_p5), %s382_s12, 256, %s384_s3, [#allocation11], %s2127_s20, %s2127_s20, %s2128_s28  }
  0x21   : > { %s404_s30 = sshll.u32 %s2657_s8, 4  ;;  %s2131_s2 = smov [#allocation13]   ;;  %s405_s30 = int_to_ptr.hbm [resolvable:$true] %s404_s30 }
  0x22   : > { %s406_s11 = sshll.u32 %s2131_s2, 4  ;;  %s1626_s19 = sadd.s32 4294967294, %s2124_s26   ;;  %s407_s11 = int_to_ptr.vmem [resolvable:$true] %s406_s11 }
  0x23   : > { %1735 = dma.hbm_to_vmem [thread:$0]  (!%p2253_p5), %s405_s30, 256, %s407_s11, [#allocation14], %s2127_s20, %s2127_s20, %s2128_s28  }
  0x24   : > { %s45_s29 = sadd.s32 1, %s2120_s25  ;;  %s54_s14 = sadd.s32 1, %s2112_s23 }
  0x25   : > { %p47_p7 = scmp.ge.s32.totalorder %s45_s29, 2  ;;  %p61_p8 = scmp.ne.s32.totalorder %s2112_s23, %s2108_s22 }
  0x26   : > { %p62_p9 = scmp.eq.s32.totalorder %s2124_s26, 0  ;;  %p67_p11 = scmp.ne.s32.totalorder %s2108_s22, %s2104_s21 }
  0x27   : > { %s2678_s29 = smov (%p47_p7, %s45_s29), 0  ;;  %p329_p12 = scmp.eq.s32.totalorder %s2237_s27, 1 }
  0x28   : > { %2658 = sst [smem:[#allocation25_spill]] %s2678_s29  ;;  %p2283_p10 = por %p62_p9, %p61_p8 }
  0x29   : > { %s49_s12 = ssub.s32 %s2120_s25, %s2678_s29  ;;  %p2294_p0 = por %p68_p1, %p67_p11 }
  0x2a   : > { %p52_p13 = scmp.eq.s32.totalorder %s49_s12, 0  ;;  %p2298_p2 = por %p329_p12, %p61_p8 }
  0x2b   : > { %p335_p4 = scmp.eq.s32.totalorder %s1626_s19, 1  ;;  %p1751_p7 = scmp.lt.s32.totalorder %s2124_s26, 2 }
  0x2c   : > { %s2661_s20 = scalar_select %p2298_p2, 1, 0 }
  0x2d   : > { %s2303_s28 = scalar_select %p52_p13, %s2112_s23, %s54_s14  }
  0x2e   : > { %2662 = sst [smem:[#allocation26_spill]] %s2661_s20  ;;  %p2305_p5 = por %p335_p4, %p67_p11 }
  0x2f   : > { %2663 = sst [smem:[#allocation27_spill]] %s2303_s28  ;;  %s429_s18 = sand.u32 1, %s2112_s23  }
  0x30   : > { %s2664_s17 = scalar_select %p2305_p5, 1, 0 }
  0x31   : > { %s1634_s30 = sshll.u32 %s2120_s25, 3  ;;  %s1633_s15 = sshll.u32 %s429_s18, 3 }
  0x32   : > { %2665 = sst [smem:[#allocation28_spill]] %s2664_s17  ;;  %s438_s12 = scalar_lea.hbm %s2622_s0, %s1634_s30 }
  0x33   : > { %s440_s4 = sshll.u32 %s438_s12, 4  ;;  %s433_s8 = scalar_lea.vmem [#allocation4], %s1633_s15  ;;  %s441_s4 = int_to_ptr.hbm [resolvable:$true] %s440_s4 }
  0x34   : > { %s442_s29 = sshll.u32 %s433_s8, 4  ;;  %p1737_p8 = pnand %p1751_p7, %p2283_p10  ;;  %s443_s29 = int_to_ptr.vmem [resolvable:$true] %s442_s29 }
  0x35   : > { %s457_s28 = scalar_lea.hbm %s2623_s1, %s1634_s30  ;;  %s449_s17 = sand.u32 1, %s2124_s26  }
  0x36   : > { %s430_s21 = scalar_lea.sflag [#allocation5], %s429_s18  ;;  %s459_s25 = sshll.u32 %s457_s28, 4  ;;  %s460_s25 = int_to_ptr.hbm [resolvable:$true] %s459_s25 }
  0x37   : > { %1739 = dma.hbm_to_vmem [thread:$0]  (!%p1737_p8), %s441_s4, 128, %s443_s29, %s430_s21  }
  0x38   : > { %s453_s23 = scalar_lea.vmem [#allocation7], %s1633_s15  ;;  %s450_s2 = scalar_lea.sflag [#allocation8], %s449_s17 }
  0x39   : > { %s461_s20 = sshll.u32 %s453_s23, 4  ;;  %470 = sbr.rel (%p2245_p3) target bundleno = 1325 (0x52d), region = 68  ;;  %s462_s20 = int_to_ptr.vmem [resolvable:$true] %s461_s20 }
  0x3a   : > { %1742 = dma.hbm_to_vmem [thread:$0]  (!%p1737_p8), %s460_s25, 128, %s462_s20, %s450_s2  }
  0x3b   : > { %s2324_s8 = sand.u32 (!%p2245_p3), 1, %s2108_s22  }
  0x3c   : > { %s2327_s3 = sshll.u32 (!%p2245_p3), %s2324_s8, 3  ;;  %s473_s4 = scalar_lea.sflag (!%p2245_p3), [#allocation5], %s2324_s8 }
  0x3d   : > { %s476_s21 = scalar_lea.vmem (!%p2245_p3), [#allocation4], %s2327_s3 }
  0x3e   : > { %2079 = dma.done.wait (%p2294_p0), %s473_s4, 128  }
  0x3f   : > { %2081 = vsyncadd (%p2294_p0), %s473_s4, 4294967168  ;;  %s482_s23 = sand.u32 1, %s2237_s27   ;;  %s486_s13 = scalar_lea.vmem [#allocation7], %s2327_s3 }
  0x40   : > { %s483_s25 = scalar_lea.sflag [#allocation8], %s482_s23 }
  0x41   : > { %2083 = dma.done.wait (%p2294_p0), %s483_s25, 128  }
  0x42   : > { %2085 = vsyncadd (%p2294_p0), %s483_s25, 4294967168 }
  0x43   : > { %2087 = dma.done.wait (%p68_p1), [#allocation8], 256  }
  0x44   : > { %2089 = vsyncadd (%p68_p1), [#allocation8], 4294967040 }
  0x45   : > { %2091 = dma.done.wait (%p68_p1), [#allocation11], 512  }
  0x46   : > { %2093 = vsyncadd (%p68_p1), [#allocation11], 4294966784 }
  0x47   : > { %2095 = dma.done.wait (%p68_p1), [#allocation14], 256  }
  0x48   : > { %2097 = vsyncadd (%p68_p1), [#allocation14], 4294967040  ;;  %v1694_v0 = vld [vmem:[#allocation10 + $0x8] sm:$0xff]  ;;  %v1698_v1 = vld [vmem:[#allocation9 + $0x8] sm:$0xff]  ;;  %vm580_vm0 = vcmask 261120   ;;  %s2132_s16 = smov 104  }
  0x49   : > { %v1693_v2 = vld [vmem:[#allocation10] sm:$0xff]  ;;  %v1697_v3 = vld [vmem:[#allocation9] sm:$0xff]  ;;  %590 = vmatpush.bf16.msra.mxu0 %v1694_v0  ;;  %920 = vmatpush.bf16.msra.mxu2 %v1698_v1  ;;  %v1696_v8 = vld [vmem:[#allocation12 + $0x8] sm:$0xff]  ;;  %s2133_s20 = smov 120   ;;  %s2134_s18 = smov 112   ;;  %vm641_vm1 = vcmask 1047556  }
  0x4a   : > { %v558_v4 = vld [vmem:[%s486_s13] sm:$0xff]  ;;  %v2353_v5 = vld [vmem:[%s476_s21] sm:$0xff]  ;;  %623 = vmatpush.bf16.msra.mxu1 %v1696_v8  ;;  %v2135_v23 = vmov 1983009808   ;;  %v2136_v35 = vmov 1934713408  }
  0x4b   : > { %v559_v6 = vpack.c.bf16 %v558_v4, %v558_v4  ;;  %v889_v7 = vpack.c.bf16 %v2353_v5, %v2353_v5  ;;  %v1695_v9 = vld [vmem:[#allocation12] sm:$0xff]  ;;  %v646_v24 = vunpack.c.l.s4 %v2135_v23  ;;  %v670_v36 = vunpack.c.l.s4 %v2136_v35  ;;  %s2137_s11 = smov 24   ;;  %s2138_s12 = smov 16  }
  0x4c   : > { %v1820_v10 = vld [vmem:[%s2628_s6] ss:$0 sm:$0xff]  ;;  %vm755_vm2 = vcmask 60416   ;;  %vm1056_vm3 = vcmask 64512   ;;  %vm1180_vm4 = vcmask 1043456   ;;  %s2139_s19 = smov 8  }
  0x4d   : > { %591 = vmatpush.bf16.msra.mxu0 %v1693_v2  ;;  %921 = vmatpush.bf16.msra.mxu2 %v1697_v3  ;;  %v1821_v13 = vld [vmem:[%s2627_s5] ss:$0 sm:$0xff]  ;;  %v2374_v30 = vunpack.c.0.s8 %v646_v24  ;;  %v2383_v44 = vunpack.c.0.s8 %v670_v36  ;;  %vm1385_vm5 = vcmask 130048   ;;  %vm1387_vm6 = vcmask 195584   ;;  %s1690_s4 = sshll.u32 %s2116_s24, 3  ;;  %s2666_s27 = sld [smem:[#allocation34_spill]] }
  0x4e   : > { %624 = vmatpush.bf16.msra.mxu1 %v1695_v9  ;;  %v1822_v18 = vld [vmem:[%s2629_s7] ss:$0 sm:$0xff]  ;;  %s2668_s17 = sld [smem:[#allocation33_spill]]  ;;  %s552_s24 = scalar_lea.vmem [#allocation15], %s2327_s3 }
  0x4f   : > { %s1468_s15 = scalar_lea.sflag [#allocation6], %s2324_s8 }
  0x50   : > { %1653 = vmatmul.msk.bf16.vlgmr.msra.gmra.mxu0 %vm580_vm0, %v559_v6  ;;  %1671 = vmatmul.msk.bf16.vlgmr.msra.gmra.mxu2 %vm580_vm0, %v889_v7 }
  0x51   : > { %1662 = vmatmul.msk.bf16.vlgmr.msra.gmra.mxu1 %vm580_vm0, %v559_v6 }
  0x53   : > { %s1479_s29 = scalar_lea.hbm %s2666_s27, %s1690_s4  ;;  %s2046_s3 = scalar_lea.hbm %s2666_s27, 16 }
  0x54   : > { %s1483_s30 = sshll.u32 %s1479_s29, 4  ;;  %s1484_s30 = int_to_ptr.hbm [resolvable:$true] %s1483_s30 }
  0xcd   : > { %v593_v11 = vpop.f32.mrf.mxu0 }
  0xce   : > { %v594_v12 = vadd.f32 %v1820_v10, %v593_v11  ;;  %v626_v19 = vpop.f32.mrf.mxu1 }
  0xcf   : > { %v2369_v20 = vadd.f32 %v1822_v18, %v626_v19 }
  0xd0   : > { %637 = vrot.lane.b32.xlu1 %v594_v12, %s2132_s16  ;;  %631 = vrot.lane.b32.xlu0 %v594_v12, %s2133_s20  ;;  %v643_v42 = vrot.slane %v594_v12, 4 }
  0xd3   : > { %v923_v14 = vpop.f32.mrf.mxu2 }
  0xd4   : > { %v924_v15 = vadd.f32 %v1821_v13, %v923_v14 }
  0xd5   : > { %v595_v16 = vpop.f32.mrf.mxu0 }
  0xd6   : > { %931 = vrot.lane.b32.xlu2 %v924_v15, %s2134_s18  ;;  %v628_v22 = vpop.f32.mrf.mxu1  ;;  %v940_v29 = vrot.slane %v924_v15, 4 }
  0xd8   : > { %928 = vrot.lane.b32.xlu1 %v924_v15, %s2133_s20  ;;  %634 = vrot.lane.b32.xlu0 %v594_v12, %s2134_s18 }
  0xdb   : > { %v925_v17 = vpop.f32.mrf.mxu2 }
  0xde   : > { %934 = vrot.lane.b32.xlu2 %v924_v15, %s2132_s16 }
  0xe0   : > { %764 = vrot.lane.b32.xlu1 %v2369_v20, %s2134_s18  ;;  %761 = vrot.lane.b32.xlu0 %v2369_v20, %s2133_s20  ;;  %s1481_s18 = sshll.u32 %s552_s24, 4  ;;  %s1482_s18 = int_to_ptr.vmem [resolvable:$true] %s1481_s18 }
  0xe6   : > { %767 = vrot.lane.b32.xlu2 %v2369_v20, %s2132_s16 }
 0x130   : > { %v932_v21 = vpop.permute.xlu2 %931 }
 0x131   : > { %v937_v25 = vrot.slane %v932_v21, 4  ;;  %v941_v33 = vsel %vm641_vm1, %v932_v21, %v940_v29 }
 0x132   : > { %v949_v39 = vperm.slane %v941_v33, %v2374_v30 }
 0x133   : > { %v939_v31 = vsel %vm641_vm1, %v937_v25, %v924_v15 }
 0x134   : > { %v945_v38 = vperm.slane %v939_v31, %v2374_v30  ;;  %v976_v55 = vrot.slane %v949_v39, 4 }
 0x136   : > { %v964_v51 = vrot.slane %v945_v38, 4 }
 0x138   : > { %v935_v34 = vpop.permute.xlu2 %934 }
 0x139   : > { %v950_v41 = vrot.slane %v935_v34, 4 }
 0x142   : > { %v638_v26 = vpop.permute.xlu1 %637  ;;  %v632_v27 = vpop.permute.xlu0 %631 }
 0x143   : > { %v653_v28 = vrot.slane %v638_v26, 4  ;;  %v655_v32 = vrot.slane %v632_v27, 4 }
 0x145   : > { %v654_v37 = vsel %vm641_vm1, %v653_v28, %v632_v27  ;;  %v656_v40 = vsel %vm641_vm1, %v638_v26, %v655_v32 }
 0x146   : > { %v660_v43 = vperm.slane %v654_v37, %v2374_v30  ;;  %v664_v52 = vperm.slane %v656_v40, %v2374_v30 }
 0x148   : > { %v665_v62 = vrot.slane %v660_v43, 4  ;;  %v677_v1 = vrot.slane %v664_v52, 4 }
 0x14a   : > { %v929_v45 = vpop.permute.xlu1 %928  ;;  %v635_v46 = vpop.permute.xlu0 %634 }
 0x14b   : > { %v951_v47 = vsel %vm641_vm1, %v950_v41, %v929_v45  ;;  %v952_v48 = vrot.slane %v929_v45, 4  ;;  %v640_v49 = vrot.slane %v635_v46, 4  ;;  %v644_v50 = vsel %vm641_vm1, %v635_v46, %v643_v42 }
 0x14c   : > { %v957_v53 = vperm.slane %v951_v47, %v2374_v30  ;;  %v652_v54 = vperm.slane %v644_v50, %v2374_v30 }
 0x14d   : > { %v953_v56 = vsel %vm641_vm1, %v935_v34, %v952_v48  ;;  %v642_v57 = vsel %vm641_vm1, %v640_v49, %v594_v12 }
 0x14e   : > { %v961_v58 = vperm.slane %v953_v56, %v2374_v30  ;;  %v962_v59 = vrot.slane %v957_v53, 4  ;;  %v965_v60 = vsel %vm641_vm1, %v957_v53, %v964_v51  ;;  %v648_v61 = vperm.slane %v642_v57, %v2374_v30 }
 0x14f   : > { %v973_v63 = vperm.slane %v965_v60, %v2383_v44  ;;  %v679_v0 = vrot.slane %v652_v54, 4  ;;  %v678_v11 = vsel %vm641_vm1, %v677_v1, %v652_v54 }
 0x150   : > { %v963_v2 = vsel %vm641_vm1, %v962_v59, %v945_v38  ;;  %v974_v3 = vrot.slane %v961_v58, 4  ;;  %v977_v4 = vsel %vm641_vm1, %v961_v58, %v976_v55  ;;  %v666_v7 = vsel %vm641_vm1, %v665_v62, %v648_v61 }
 0x151   : > { %v985_v6 = vperm.slane %v977_v4, %v2383_v44  ;;  %v667_v8 = vrot.slane %v648_v61, 4  ;;  %v969_v9 = vperm.slane %v963_v2, %v2383_v44  ;;  %v680_v12 = vsel %vm641_vm1, %v664_v52, %v679_v0 }
 0x152   : > { %v975_v10 = vsel %vm641_vm1, %v974_v3, %v949_v39  ;;  %v988_v13 = vrot.slane %v973_v63, 4  ;;  %v672_v15 = vperm.slane %v666_v7, %v2383_v44  ;;  %v684_v18 = vperm.slane %v678_v11, %v2383_v44 }
 0x153   : > { %v668_v14 = vsel %vm641_vm1, %v660_v43, %v667_v8  ;;  %v981_v16 = vperm.slane %v975_v10, %v2383_v44  ;;  %v992_v17 = vrot.slane %v985_v6, 4  ;;  %v688_v19 = vperm.slane %v680_v12, %v2383_v44 }
 0x154   : > { %v986_v21 = vrot.slane %v969_v9, 4  ;;  %v676_v22 = vperm.slane %v668_v14, %v2383_v44  ;;  %v989_v23 = vsel %vm641_vm1, 0.0, %v988_v13  ;;  %v994_v24 = vsel %vm641_vm1, %v988_v13, %v969_v9 }
 0x155   : > { %v689_v25 = vrot.slane %v672_v15, 4  ;;  %v990_v27 = vrot.slane %v981_v16, 4  ;;  %v993_v28 = vsel %vm641_vm1, 0.0, %v992_v17  ;;  %v693_v29 = vrot.slane %v684_v18, 4 }
 0x156   : > { %v691_v26 = vrot.slane %v676_v22, 4  ;;  %v695_v31 = vrot.slane %v688_v19, 4  ;;  %v987_v32 = vsel %vm641_vm1, 0.0, %v986_v21  ;;  %v999_v33 = vrot.slane %v989_v23, 4 }
 0x157   : > { %v1010_v40 = vrot.slane %v993_v28, 4  ;;  %v690_v41 = vsel %vm641_vm1, 0.0, %v689_v25  ;;  %v991_v45 = vsel %vm641_vm1, 0.0, %v990_v27  ;;  %v694_v46 = vsel %vm641_vm1, 0.0, %v693_v29 }
 0x158   : > { %v692_v34 = vsel %vm641_vm1, 0.0, %v691_v26  ;;  %v697_v35 = vsel %vm641_vm1, %v691_v26, %v672_v15  ;;  %v696_v36 = vsel %vm641_vm1, 0.0, %v695_v31  ;;  %v708_v39 = vsel %vm641_vm1, %v695_v31, %v684_v18 }
 0x159   : > { %v701_v37 = vperm.slane %v697_v35, %v2374_v30  ;;  %v702_v38 = vrot.slane %v692_v34, 4  ;;  %v712_v42 = vperm.slane %v708_v39, %v2374_v30  ;;  %v713_v43 = vrot.slane %v696_v36, 4 }
 0x15a   : > { %v1005_v49 = vsel %vm641_vm1, %v992_v17, %v981_v16  ;;  %v1000_v53 = vsel %vm641_vm1, %v999_v33, %v987_v32  ;;  %v998_v55 = vperm.slane %v994_v24, %v2374_v30  ;;  %v1011_v56 = vsel %vm641_vm1, %v1010_v40, %v991_v45 }
 0x15b   : > { %v703_v47 = vsel %vm641_vm1, %v702_v38, %v690_v41  ;;  %v721_v48 = vrot.slane %v701_v37, 4  ;;  %v714_v51 = vsel %vm641_vm1, %v713_v43, %v694_v46  ;;  %v733_v52 = vrot.slane %v712_v42, 4 }
 0x15c   : > { %v707_v50 = vperm.slane %v703_v47, %v2374_v30  ;;  %v718_v54 = vperm.slane %v714_v51, %v2374_v30  ;;  %v1009_v59 = vperm.slane %v1005_v49, %v2374_v30  ;;  %v1004_v63 = vperm.slane %v1000_v53, %v2374_v30 }
 0x15d   : > { %v1015_v6 = vperm.slane %v1011_v56, %v2374_v30  ;;  %v1018_v7 = vrot.slane %v998_v55, 4 }
 0x15e   : > { %v719_v57 = vrot.slane %v707_v50, 4  ;;  %v722_v58 = vsel %vm641_vm1, %v707_v50, %v721_v48  ;;  %v731_v61 = vrot.slane %v718_v54, 4  ;;  %v734_v62 = vsel %vm641_vm1, %v718_v54, %v733_v52  ;;  %v768_v54 = vpop.permute.xlu2 %767 }
 0x15f   : > { %v730_v60 = vperm.slane %v722_v58, %v2383_v44  ;;  %v742_v1 = vperm.slane %v734_v62, %v2383_v44  ;;  %v1030_v12 = vrot.slane %v1009_v59, 4  ;;  %v1016_v16 = vrot.slane %v1004_v63, 4  ;;  %v762_v58 = vpop.permute.xlu0 %761 }
 0x160   : > { %v720_v0 = vsel %vm641_vm1, %v719_v57, %v701_v37  ;;  %v732_v3 = vsel %vm641_vm1, %v731_v61, %v712_v42  ;;  %v1028_v19 = vrot.slane %v1015_v6, 4  ;;  %v1019_v23 = vsel %vm641_vm1, %v1004_v63, %v1018_v7  ;;  %v765_v57 = vpop.permute.xlu1 %764 }
 0x161   : > { %v726_v2 = vperm.slane %v720_v0, %v2383_v44  ;;  %v749_v4 = vrot.slane %v730_v60, 4  ;;  %v738_v8 = vperm.slane %v732_v3, %v2383_v44  ;;  %v747_v9 = vrot.slane %v742_v1, 4 }
 0x162   : > { %v1031_v25 = vsel %vm641_vm1, %v1015_v6, %v1030_v12  ;;  %v1017_v26 = vsel %vm641_vm1, %v1016_v16, %v998_v55  ;;  %v1027_v27 = vperm.slane %v1019_v23, %v2383_v44  ;;  %v1029_v28 = vsel %vm641_vm1, %v1028_v19, %v1009_v59 }
 0x163   : > { %v745_v10 = vrot.slane %v726_v2, 4  ;;  %v750_v11 = vsel %vm641_vm1, %v742_v1, %v749_v4  ;;  %v743_v13 = vrot.slane %v738_v8, 4  ;;  %v748_v14 = vsel %vm641_vm1, %v747_v9, %v730_v60 }
 0x164   : > { %v754_v15 = vpack.c.bf16 %v750_v11, %v750_v11  ;;  %v753_v18 = vpack.c.bf16 %v748_v14, %v748_v14  ;;  %v1039_v29 = vperm.slane %v1031_v25, %v2383_v44  ;;  %v1023_v31 = vperm.slane %v1017_v26, %v2383_v44 }
 0x165   : > { %v746_v17 = vsel %vm641_vm1, %v738_v8, %v745_v10  ;;  %v744_v21 = vsel %vm641_vm1, %v743_v13, %v726_v2  ;;  %v1035_v32 = vperm.slane %v1029_v28, %v2383_v44  ;;  %v1046_v34 = vrot.slane %v1027_v27, 4 }
 0x166   : > { %v752_v22 = vpack.c.bf16 %v746_v17, %v746_v17  ;;  %759 = vst.msk [vmem:[#allocation2 + $0xc] sm:$0xf] %vm755_vm2, %v754_v15  ;;  %v751_v24 = vpack.c.bf16 %v744_v21, %v744_v21  ;;  %v1044_v37 = vrot.slane %v1039_v29, 4  ;;  %v1042_v40 = vrot.slane %v1023_v31, 4 }
 0x167   : > { %758 = vst.msk [vmem:[#allocation2 + $0x8] sm:$0xf] %vm755_vm2, %v753_v18  ;;  %v1040_v43 = vrot.slane %v1035_v32, 4  ;;  %v1047_v46 = vsel %vm641_vm1, %v1039_v29, %v1046_v34  ;;  %v772_v55 = vrot.slane %v2369_v20, 4  ;;  %v782_v56 = vrot.slane %v768_v54, 4 }
 0x168   : > { %757 = vst.msk [vmem:[#allocation2 + $0x4] sm:$0xf] %vm755_vm2, %v752_v22  ;;  %v1045_v47 = vsel %vm641_vm1, %v1044_v37, %v1027_v27  ;;  %v1043_v48 = vsel %vm641_vm1, %v1035_v32, %v1042_v40  ;;  %v1051_v50 = vpack.c.bf16 %v1047_v46, %v1047_v46  ;;  %v770_v59 = vrot.slane %v765_v57, 4 }
 0x169   : > { %756 = vst.msk [vmem:[#allocation2] sm:$0xf] %vm755_vm2, %v751_v24  ;;  %v1041_v49 = vsel %vm641_vm1, %v1040_v43, %v1023_v31  ;;  %v1050_v51 = vpack.c.bf16 %v1045_v47, %v1045_v47  ;;  %v1049_v52 = vpack.c.bf16 %v1043_v48, %v1043_v48  ;;  %v773_v60 = vsel %vm641_vm1, %v765_v57, %v772_v55 }
 0x16a   : > { %v1048_v53 = vpack.c.bf16 %v1041_v49, %v1041_v49  ;;  %v784_v61 = vrot.slane %v762_v58, 4  ;;  %v783_v62 = vsel %vm641_vm1, %v782_v56, %v762_v58  ;;  %v781_v63 = vperm.slane %v773_v60, %v2374_v30 }
 0x16b   : > { %v789_v0 = vperm.slane %v783_v62, %v2374_v30  ;;  %v771_v1 = vsel %vm641_vm1, %v770_v59, %v2369_v20 }
 0x16c   : > { %v785_v2 = vsel %vm641_vm1, %v768_v54, %v784_v61  ;;  %v777_v3 = vperm.slane %v771_v1, %v2374_v30  ;;  %v808_v4 = vrot.slane %v781_v63, 4 }
 0x16d   : > { %v1055_v33 = vld [vmem:[#allocation2 + $0xc] sm:$0xf]  ;;  %v793_v6 = vperm.slane %v785_v2, %v2374_v30  ;;  %v794_v7 = vrot.slane %v789_v0, 4 }
 0x16e   : > { %v1054_v35 = vld [vmem:[#allocation2 + $0x8] sm:$0xf]  ;;  %v1118_v36 = vsel %vm1056_vm3, %v1055_v33, 0  ;;  %v796_v8 = vrot.slane %v777_v3, 4 }
 0x16f   : > { %v1099_v38 = vsel %vm1056_vm3, %v1054_v35, 0  ;;  %1127 = vmatpush.bf16.xpose.msrb.mxu2 %v1118_v36  ;;  %v1053_v39 = vld [vmem:[#allocation2 + $0x4] sm:$0xf]  ;;  %v795_v9 = vsel %vm641_vm1, %v794_v7, %v777_v3  ;;  %v806_v10 = vrot.slane %v793_v6, 4  ;;  %v809_v11 = vsel %vm641_vm1, %v793_v6, %v808_v4 }
 0x170   : > { %1108 = vmatpush.bf16.xpose.msrb.mxu1 %v1099_v38  ;;  %v1052_v41 = vld [vmem:[#allocation2] sm:$0xf]  ;;  %v1080_v42 = vsel %vm1056_vm3, %v1053_v39, 0  ;;  %v801_v12 = vperm.slane %v795_v9, %v2383_v44  ;;  %v817_v13 = vperm.slane %v809_v11, %v2383_v44  ;;  %v797_v20 = vsel %vm641_vm1, %v789_v0, %v796_v8 }
 0x171   : > { %v1061_v45 = vsel %vm1056_vm3, %v1052_v41, 0  ;;  %1089 = vmatpush.bf16.xpose.msrb.mxu0 %v1080_v42  ;;  %v807_v14 = vsel %vm641_vm1, %v806_v10, %v781_v63  ;;  %v805_v15 = vperm.slane %v797_v20, %v2383_v44 }
 0x172   : > { %1070 = vmatpush.bf16.xpose.msra.mxu3 %v1061_v45  ;;  %v813_v16 = vperm.slane %v807_v14, %v2383_v44  ;;  %v818_v17 = vrot.slane %v801_v12, 4  ;;  %v824_v18 = vrot.slane %v817_v13, 4 }
 0x173   : > { %v820_v19 = vrot.slane %v805_v15, 4 }
 0x174   : > { %v822_v21 = vrot.slane %v813_v16, 4  ;;  %v825_v22 = vsel %vm641_vm1, 0.0, %v824_v18  ;;  %v819_v23 = vsel %vm641_vm1, 0.0, %v818_v17  ;;  %v837_v24 = vsel %vm641_vm1, %v824_v18, %v813_v16 }
 0x175   : > { %v842_v25 = vrot.slane %v825_v22, 4  ;;  %v821_v26 = vsel %vm641_vm1, 0.0, %v820_v19  ;;  %v826_v28 = vsel %vm641_vm1, %v820_v19, %v801_v12  ;;  %v841_v29 = vperm.slane %v837_v24, %v2374_v30 }
 0x176   : > { %1675 = vmatmul.msk.bf16.vlgmr.msrb.gmra.mxu2 %vm1056_vm3, %v1051_v50  ;;  %v823_v27 = vsel %vm641_vm1, 0.0, %v822_v21  ;;  %v830_v31 = vperm.slane %v826_v28, %v2374_v30  ;;  %v831_v32 = vrot.slane %v821_v26, 4 }
 0x177   : > { %1674 = vmatmul.msk.bf16.vlgmr.msrb.gmra.mxu1 %vm1056_vm3, %v1050_v51  ;;  %v843_v33 = vsel %vm641_vm1, %v842_v25, %v823_v27  ;;  %v862_v35 = vrot.slane %v841_v29, 4 }
 0x178   : > { %1673 = vmatmul.msk.bf16.vlgmr.msrb.gmra.mxu0 %vm1056_vm3, %v1049_v52  ;;  %v847_v34 = vperm.slane %v843_v33, %v2374_v30  ;;  %v832_v36 = vsel %vm641_vm1, %v831_v32, %v819_v23  ;;  %v850_v37 = vrot.slane %v830_v31, 4 }
 0x179   : > { %1672 = vmatmul.msk.bf16.vlgmr.msra.gmra.mxu3 %vm1056_vm3, %v1048_v53  ;;  %v836_v38 = vperm.slane %v832_v36, %v2374_v30 }
 0x17a   : > { %v860_v39 = vrot.slane %v847_v34, 4  ;;  %v863_v40 = vsel %vm641_vm1, %v847_v34, %v862_v35 }
 0x17b   : > { %v871_v41 = vperm.slane %v863_v40, %v2383_v44  ;;  %v848_v42 = vrot.slane %v836_v38, 4  ;;  %v851_v43 = vsel %vm641_vm1, %v836_v38, %v850_v37 }
 0x17c   : > { %v861_v45 = vsel %vm641_vm1, %v860_v39, %v841_v29  ;;  %v859_v46 = vperm.slane %v851_v43, %v2383_v44 }
 0x17d   : > { %v867_v47 = vperm.slane %v861_v45, %v2383_v44  ;;  %v876_v48 = vrot.slane %v871_v41, 4  ;;  %v849_v49 = vsel %vm641_vm1, %v848_v42, %v830_v31 }
 0x17e   : > { %v855_v50 = vperm.slane %v849_v49, %v2383_v44  ;;  %v878_v53 = vrot.slane %v859_v46, 4 }
 0x17f   : > { %v872_v51 = vrot.slane %v867_v47, 4  ;;  %v877_v52 = vsel %vm641_vm1, %v876_v48, %v859_v46 }
 0x180   : > { %v882_v54 = vpack.c.bf16 %v877_v52, %v877_v52  ;;  %v874_v56 = vrot.slane %v855_v50, 4  ;;  %v879_v57 = vsel %vm641_vm1, %v871_v41, %v878_v53 }
 0x181   : > { %v873_v55 = vsel %vm641_vm1, %v872_v51, %v855_v50  ;;  %v883_v59 = vpack.c.bf16 %v879_v57, %v879_v57 }
 0x182   : > { %v880_v58 = vpack.c.bf16 %v873_v55, %v873_v55  ;;  %886 = vst.msk [vmem:[#allocation3 + $0x8] sm:$0xf] %vm755_vm2, %v882_v54  ;;  %v875_v60 = vsel %vm641_vm1, %v867_v47, %v874_v56 }
 0x183   : > { %v881_v61 = vpack.c.bf16 %v875_v60, %v875_v60  ;;  %887 = vst.msk [vmem:[#allocation3 + $0xc] sm:$0xf] %vm755_vm2, %v883_v59 }
 0x184   : > { %884 = vst.msk [vmem:[#allocation3] sm:$0xf] %vm755_vm2, %v880_v58 }
 0x185   : > { %885 = vst.msk [vmem:[#allocation3 + $0x4] sm:$0xf] %vm755_vm2, %v881_v61 }
 0x189   : > { %v1175_v1 = vld [vmem:[#allocation3 + $0x8] sm:$0xf] }
 0x18a   : > { %v1220_v3 = vsel %vm1180_vm4, %v1175_v1, 0  ;;  %v1176_v4 = vld [vmem:[#allocation3 + $0xc] sm:$0xf] }
 0x18b   : > { %v1173_v62 = vld [vmem:[#allocation3] sm:$0xf]  ;;  %1229 = vmatpush.bf16.msra.mxu1 %v1220_v3  ;;  %v1239_v6 = vsel %vm1180_vm4, %v1176_v4, 0 }
 0x18c   : > { %v1182_v63 = vsel %vm1180_vm4, %v1173_v62, 0  ;;  %v1174_v0 = vld [vmem:[#allocation3 + $0x4] sm:$0xf]  ;;  %1248 = vmatpush.bf16.msra.mxu2 %v1239_v6 }
 0x18d   : > { %1191 = vmatpush.bf16.msrb.mxu3 %v1182_v63  ;;  %v1201_v2 = vsel %vm1180_vm4, %v1174_v0, 0 }
 0x18e   : > { %1210 = vmatpush.bf16.msra.mxu0 %v1201_v2 }
 0x1f4   : > { %v1110_v7 = vpop.f32.mrf.mxu1 }
 0x1f5   : > { %v1139_v8 = vsel %vm1056_vm3, %v1110_v7, -inf  ;;  %v1091_v9 = vpop.f32.mrf.mxu0 }
 0x1f6   : > { %1140 = vmax.xlane.f32.xlu2 %v1139_v8  ;;  %v1136_v20 = vsel %vm1056_vm3, %v1091_v9, -inf }
 0x1f9   : > { %v1129_v10 = vpop.f32.mrf.mxu2 }
 0x1fa   : > { %v1142_v11 = vsel %vm1056_vm3, %v1129_v10, -inf }
 0x1fb   : > { %1143 = vmax.xlane.f32.xlu1 %v1142_v11 }
 0x1fc   : > { %v1072_v12 = vpop.f32.mrf.mxu3  ;;  %v1112_v13 = vpop.f32.mrf.mxu1 }
 0x1fd   : > { %v1133_v14 = vsel %vm1056_vm3, %v1072_v12, -inf  ;;  %v1093_v15 = vpop.f32.mrf.mxu0 }
 0x1fe   : > { %1137 = vmax.xlane.f32.xlu2 %v1136_v20  ;;  %1134 = vmax.xlane.f32.xlu0 %v1133_v14 }
 0x201   : > { %v1131_v16 = vpop.f32.mrf.mxu2 }
 0x204   : > { %v1074_v17 = vpop.f32.mrf.mxu3 }
 0x269   : > { %v1141_v18 = vpop.xlane.xlu2 %1140 }
 0x26a   : > { %v1147_v19 = vsub.f32 %v1110_v7, %v1141_v18 }
 0x26c   : > { %v1153_v21 = vmul.f32 1.442695, %v1147_v19 }
 0x26e   : > { %1826 = vpow2.f32 %v1153_v21  ;;  %v1144_v22 = vpop.xlane.xlu1 %1143 }
 0x26f   : > { %v1148_v23 = vsub.f32 %v1129_v10, %v1144_v22 }
 0x271   : > { %v1155_v24 = vmul.f32 1.442695, %v1148_v23  ;;  %v1138_v25 = vpop.xlane.xlu2 %1137  ;;  %v1135_v26 = vpop.xlane.xlu0 %1134 }
 0x272   : > { %v1146_v27 = vsub.f32 %v1091_v9, %v1138_v25  ;;  %v1145_v28 = vsub.f32 %v1072_v12, %v1135_v26 }
 0x273   : > { %1828 = vpow2.f32 %v1155_v24 }
 0x274   : > { %v1827_v29 = vpop.eup %1826  ;;  %v1151_v31 = vmul.f32 1.442695, %v1146_v27  ;;  %v1149_v32 = vmul.f32 1.442695, %v1145_v28 }
 0x275   : > { %v1171_v33 = vpack.c.bf16 %v1827_v29, %v1827_v29  ;;  %v1163_v34 = vsel %vm1056_vm3, %v1827_v29, 0.0 }
 0x276   : > { %1830 = vpow2.f32 %v1151_v31  ;;  %1164 = vadd.xlane.f32.xlu0 %v1163_v34 }
 0x277   : > { %1832 = vpow2.f32 %v1149_v32  ;;  %1678 = vmatmul.msk.bf16.vlgmr.msra.gmra.mxu1 %vm1056_vm3, %v1171_v33 }
 0x279   : > { %v1829_v35 = vpop.eup %1828 }
 0x27a   : > { %v1172_v36 = vpack.c.bf16 %v1829_v35, %v1829_v35  ;;  %v1166_v37 = vsel %vm1056_vm3, %v1829_v35, 0.0 }
 0x27b   : > { %1167 = vadd.xlane.f32.xlu2 %v1166_v37 }
 0x27c   : > { %v1831_v38 = vpop.eup %1830  ;;  %1679 = vmatmul.msk.bf16.vlgmr.msra.gmra.mxu2 %vm1056_vm3, %v1172_v36 }
 0x27d   : > { %v1833_v39 = vpop.eup %1832  ;;  %v1170_v40 = vpack.c.bf16 %v1831_v38, %v1831_v38  ;;  %v1160_v41 = vsel %vm1056_vm3, %v1831_v38, 0.0 }
 0x27e   : > { %1161 = vadd.xlane.f32.xlu0 %v1160_v41  ;;  %v1157_v42 = vsel %vm1056_vm3, %v1833_v39, 0.0  ;;  %v1169_v43 = vpack.c.bf16 %v1833_v39, %v1833_v39 }
 0x27f   : > { %1158 = vadd.xlane.f32.xlu1 %v1157_v42  ;;  %1677 = vmatmul.msk.bf16.vlgmr.msra.gmra.mxu0 %vm1056_vm3, %v1170_v40 }
 0x280   : > { %1676 = vmatmul.msk.bf16.vlgmr.msrb.gmra.mxu3 %vm1056_vm3, %v1169_v43 }
 0x2e9   : > { %v1165_v45 = vpop.xlane.xlu0 %1164 }
 0x2ee   : > { %v1168_v48 = vpop.xlane.xlu2 %1167 }
 0x2f1   : > { %v1162_v46 = vpop.xlane.xlu0 %1161 }
 0x2f2   : > { %1834 = vrcp.f32 %v1162_v46  ;;  %v1159_v49 = vpop.xlane.xlu1 %1158 }
 0x2f3   : > { %1836 = vrcp.f32 %v1165_v45 }
 0x2f4   : > { %v1231_v47 = vpop.f32.mrf.mxu1  ;;  %1838 = vrcp.f32 %v1168_v48 }
 0x2f5   : > { %1840 = vrcp.f32 %v1159_v49 }
 0x2f8   : > { %v1835_v50 = vpop.eup %1834 }
 0x2f9   : > { %v1837_v54 = vpop.eup %1836 }
 0x2fa   : > { %v1839_v55 = vpop.eup %1838  ;;  %v1260_v57 = vmul.f32 %v1837_v54, %v1231_v47 }
 0x2fb   : > { %v1841_v62 = vpop.eup %1840 }
 0x2fc   : > { %v1212_v51 = vpop.f32.mrf.mxu0  ;;  %v1233_v52 = vpop.f32.mrf.mxu1  ;;  %v1262_v1 = vrot.slane %v1260_v57, 4 }
 0x2fd   : > { %v1259_v53 = vmul.f32 %v1835_v50, %v1212_v51 }
 0x2ff   : > { %v1250_v56 = vpop.f32.mrf.mxu2  ;;  %v1276_v58 = vrot.slane %v1259_v53, 4 }
 0x300   : > { %v1261_v59 = vmul.f32 %v1839_v55, %v1250_v56 }
 0x302   : > { %v1274_v60 = vrot.slane %v1261_v59, 4  ;;  %v1277_v61 = vsel %vm641_vm1, %v1261_v59, %v1276_v58 }
 0x303   : > { %v1193_v63 = vpop.f32.mrf.mxu3  ;;  %v1285_v0 = vperm.slane %v1277_v61, %v2374_v30 }
 0x304   : > { %v1258_v2 = vmul.f32 %v1841_v62, %v1193_v63  ;;  %v1275_v3 = vsel %vm641_vm1, %v1274_v60, %v1259_v53  ;;  %v1214_v4 = vpop.f32.mrf.mxu0 }
 0x305   : > { %v1281_v6 = vperm.slane %v1275_v3, %v2374_v30  ;;  %v1298_v11 = vrot.slane %v1285_v0, 4 }
 0x306   : > { %v1263_v7 = vsel %vm641_vm1, %v1262_v1, %v1258_v2  ;;  %v1264_v8 = vrot.slane %v1258_v2, 4  ;;  %v1700_v1 = vld [vmem:[#allocation13 + $0x8] sm:$0xff]  ;;  %v1699_v2 = vld [vmem:[#allocation13] sm:$0xff] }
 0x307   : > { %v1269_v9 = vperm.slane %v1263_v7, %v2374_v30  ;;  %v1286_v10 = vrot.slane %v1281_v6, 4  ;;  %v1252_v12 = vpop.f32.mrf.mxu2  ;;  %1419 = vmatpush.bf16.msra.mxu3 %v1700_v1 }
 0x308   : > { %v1265_v13 = vsel %vm641_vm1, %v1260_v57, %v1264_v8 }
 0x309   : > { %v1273_v20 = vperm.slane %v1265_v13, %v2374_v30  ;;  %v1288_v14 = vrot.slane %v1269_v9, 4  ;;  %v1287_v15 = vsel %vm641_vm1, %v1286_v10, %v1269_v9  ;;  %v1823_v10 = vld [vmem:[%s2631_s9] ss:$0 sm:$0xff] }
 0x30a   : > { %v1293_v16 = vperm.slane %v1287_v15, %v2383_v44  ;;  %v2140_v15 = vmov 32.0  }
 0x30b   : > { %v1300_v17 = vrot.slane %v1273_v20, 4  ;;  %v1289_v18 = vsel %vm641_vm1, %v1281_v6, %v1288_v14  ;;  %v1299_v19 = vsel %vm641_vm1, %v1298_v11, %v1273_v20  ;;  %v1195_v21 = vpop.f32.mrf.mxu3  ;;  %1420 = vmatpush.bf16.msra.mxu3 %v1699_v2  ;;  %1842 = vrcp.f32 %v2140_v15 }
 0x30c   : > { %v1297_v22 = vperm.slane %v1289_v18, %v2383_v44  ;;  %v1305_v23 = vperm.slane %v1299_v19, %v2383_v44  ;;  %v1310_v24 = vrot.slane %v1293_v16, 4 }
 0x30d   : > { %v1301_v25 = vsel %vm641_vm1, %v1285_v0, %v1300_v17 }
 0x30e   : > { %v1309_v26 = vperm.slane %v1301_v25, %v2383_v44  ;;  %v1312_v27 = vrot.slane %v1297_v22, 4  ;;  %v1314_v28 = vrot.slane %v1305_v23, 4  ;;  %v1311_v32 = vsel %vm641_vm1, 0.0, %v1310_v24 }
 0x310   : > { %v1313_v29 = vsel %vm641_vm1, 0.0, %v1312_v27  ;;  %v1316_v31 = vrot.slane %v1309_v26, 4  ;;  %v1318_v33 = vsel %vm641_vm1, %v1312_v27, %v1293_v16  ;;  %v1315_v42 = vsel %vm641_vm1, 0.0, %v1314_v28 }
 0x311   : > { %v1323_v34 = vrot.slane %v1313_v29, 4  ;;  %v1322_v35 = vperm.slane %v1318_v33, %v2374_v30  ;;  %v1843_v16 = vpop.eup %1842 }
 0x312   : > { %v1317_v36 = vsel %vm641_vm1, 0.0, %v1316_v31  ;;  %v1329_v37 = vsel %vm641_vm1, %v1316_v31, %v1305_v23  ;;  %v1431_v17 = vmul.f32 32.0, %v1843_v16  ;;  %vm1435_vm7 = vweird.f32 %v1843_v16 }
 0x313   : > { %v1334_v38 = vrot.slane %v1317_v36, 4  ;;  %v1324_v39 = vsel %vm641_vm1, %v1323_v34, %v1311_v32  ;;  %v1333_v40 = vperm.slane %v1329_v37, %v2374_v30  ;;  %v1342_v41 = vrot.slane %v1322_v35, 4  ;;  %v1824_v37 = vld [vmem:[%s2632_s10] ss:$0 sm:$0xff] }
 0x314   : > { %v1328_v43 = vperm.slane %v1324_v39, %v2374_v30  ;;  %v1432_v18 = vsub.f32 1.0, %v1431_v17 }
 0x315   : > { %v1335_v45 = vsel %vm641_vm1, %v1334_v38, %v1315_v42  ;;  %v1354_v46 = vrot.slane %v1333_v40, 4 }
 0x316   : > { %v1339_v47 = vperm.slane %v1335_v45, %v2374_v30  ;;  %v1343_v48 = vsel %vm641_vm1, %v1328_v43, %v1342_v41  ;;  %v1340_v49 = vrot.slane %v1328_v43, 4  ;;  %v1433_v19 = vmul.f32 %v1843_v16, %v1432_v18 }
 0x317   : > { %v1351_v50 = vperm.slane %v1343_v48, %v2383_v44 }
 0x318   : > { %v1355_v51 = vsel %vm641_vm1, %v1339_v47, %v1354_v46  ;;  %v1341_v52 = vsel %vm641_vm1, %v1340_v49, %v1322_v35  ;;  %v1352_v53 = vrot.slane %v1339_v47, 4  ;;  %v1434_v21 = vadd.f32 %v1843_v16, %v1433_v19 }
 0x319   : > { %v1363_v54 = vperm.slane %v1355_v51, %v2383_v44  ;;  %v1370_v55 = vrot.slane %v1351_v50, 4  ;;  %v1347_v56 = vperm.slane %v1341_v52, %v2383_v44 }
 0x31a   : > { %v1353_v57 = vsel %vm641_vm1, %v1352_v53, %v1333_v40  ;;  %v1436_v22 = vsel %vm1435_vm7, %v1843_v16, %v1434_v21  ;;  %v1825_v40 = vld [vmem:[%s2668_s17] ss:$0 sm:$0xff] }
 0x31b   : > { %v1371_v58 = vsel %vm641_vm1, %v1363_v54, %v1370_v55  ;;  %v1368_v30 = vrot.slane %v1363_v54, 4  ;;  %v1359_v59 = vperm.slane %v1353_v57, %v2383_v44  ;;  %v1366_v60 = vrot.slane %v1347_v56, 4 }
 0x31c   : > { %1381 = vrot.lane.b32.xlu0 %v1371_v58, %s2137_s11  ;;  %s2040_s11 = sshra.s32 %s1484_s30, 4  ;;  %s2041_s11 = int_to_ptr.hbm [resolvable:$true] %s2040_s11 }
 0x31d   : > { %v1369_v61 = vsel %vm641_vm1, %v1368_v30, %v1351_v50  ;;  %v1364_v62 = vrot.slane %v1359_v59, 4  ;;  %v1367_v63 = vsel %vm641_vm1, %v1359_v59, %v1366_v60  ;;  %p2047_p10 = scmp.lt.s32.totalorder %s2041_s11, %s2666_s27 }
 0x31e   : > { %1377 = vrot.lane.b32.xlu2 %v1369_v61, %s2138_s12  ;;  %1373 = vrot.lane.b32.xlu1 %v1367_v63, %s2139_s19  ;;  %s2042_s12 = scalar_lea.hbm %s2041_s11, 8 }
 0x31f   : > { %v1365_v0 = vsel %vm641_vm1, %v1364_v62, %v1347_v56  ;;  %p2043_p1 = scmp.ne.s32.totalorder %s2041_s11, %s2042_s12  ;;  %p2048_p11 = scmp.lt.s32.totalorder %s2046_s3, %s2042_s12 }
 0x321   : > { %p2044_p3 = pnand %p2043_p1, %p2298_p2  ;;  %p2049_p12 = por %p2048_p11, %p2047_p10 }
 0x323   : > { %p2045_p9 = pneg %p2044_p3 }
 0x325   : > { %p2050_p13 = pnand %p2049_p12, %p2045_p9 }
 0x378   : > { %v1378_v3 = vpop.permute.xlu2 %1377 }
 0x38e   : > { %v1382_v6 = vpop.permute.xlu0 %1381 }
 0x390   : > { %v1374_v44 = vpop.permute.xlu1 %1373 }
 0x391   : > { %v1384_v4 = vsel %vm1056_vm3, %v1365_v0, %v1374_v44 }
 0x392   : > { %v1386_v7 = vsel %vm1385_vm5, %v1384_v4, %v1378_v3 }
 0x393   : > { %v1388_v8 = vsel %vm1387_vm6, %v1386_v7, %v1382_v6 }
 0x394   : > { %v1389_v9 = vpack.c.bf16 %v1388_v8, %v1388_v8 }
 0x396   : > { %1688 = vmatmul.msk.bf16.vlgmr.msra.gmra.mxu3 %vm580_vm0, %v1389_v9 }
 0x419   : > { %v1422_v11 = vpop.f32.mrf.mxu3 }
 0x41a   : > { %v1423_v12 = vadd.f32 %v1823_v10, %v1422_v11 }
 0x41c   : > { %v1426_v13 = vadd.f32 %v1423_v12, %v2353_v5 }
 0x41e   : > { %v1427_v20 = vsel %vm580_vm0, %v1426_v13, 0.0 }
 0x41f   : > { %1428 = vadd.xlane.f32.xlu1 %v1427_v20 }
 0x421   : > { %v1424_v14 = vpop.f32.mrf.mxu3 }
 0x492   : > { %v1429_v23 = vpop.xlane.xlu1 %1428 }
 0x493   : > { %v1437_v24 = vmul.f32 %v1436_v22, %v1429_v23 }
 0x495   : > { %v1438_v25 = vsub.f32 %v1426_v13, %v1437_v24 }
 0x497   : > { %v1439_v26 = vmul.f32 %v1438_v25, %v1438_v25 }
 0x499   : > { %v1440_v5 = vsel %vm580_vm0, %v1439_v26, 0.0 }
 0x49a   : > { %1441 = vadd.xlane.f32.xlu0 %v1440_v5 }
 0x50d   : > { %v1442_v27 = vpop.xlane.xlu0 %1441 }
 0x50e   : > { %v1443_v28 = vmul.f32 %v1442_v27, %v1436_v22 }
 0x510   : > { %v1444_v29 = vadd.f32 1e-05, %v1443_v28 }
 0x512   : > { %1844 = vrsqrt.f32 %v1444_v29  ;;  %vm1451_vm9 = vweird.f32 %v1444_v29 }
 0x518   : > { %v1845_v31 = vpop.eup %1844 }
 0x519   : > { %v1446_v32 = vmul.f32 %v1845_v31, %v1444_v29  ;;  %vm1452_vm8 = vweird.f32 %v1845_v31 }
 0x51a   : > { %vm1453_vm10 = vmor %vm1451_vm9, %vm1452_vm8 }
 0x51b   : > { %v1447_v33 = vmul.f32 %v1845_v31, %v1446_v32 }
 0x51d   : > { %v1448_v34 = vmul.f32 0.5, %v1447_v33 }
 0x51f   : > { %v1449_v35 = vsub.f32 1.5, %v1448_v34 }
 0x521   : > { %v1450_v36 = vmul.f32 %v1845_v31, %v1449_v35 }
 0x523   : > { %v1454_v38 = vsel %vm1453_vm10, %v1845_v31, %v1450_v36 }
 0x524   : > { %v1455_v39 = vmul.f32 %v1454_v38, %v1438_v25 }
 0x526   : > { %v1460_v41 = vmul.f32 %v1824_v37, %v1455_v39 }
 0x528   : > { %v1465_v42 = vadd.f32 %v1825_v40, %v1460_v41 }
 0x52a   : > { %1466 = vst.msk [vmem:[%s552_s24] sm:$0xff] %vm580_vm0, %v1465_v42 }
 0x52b   : > { %2053 = shalt.err (!%p2050_p13)
}
 0x52c   : > { %1721 = dma.vmem_to_hbm [thread:$0]  (%p2298_p2), %s1482_s18, 128, %s1484_s30, %s1468_s15  }
 0x52d PF: > { %s2669_s8 = sld [smem:[#allocation22_spill]]  ;;  %p1744_p0 = pnand %p1632_p6, %p2305_p5 }
 0x52f   : > { %p1745_p4 = pneg %p1744_p0 }
 0x533   : > { %s1495_s23 = sand.u32 1, %s2669_s8  }
 0x534   : > { %s1496_s25 = scalar_lea.sflag [#allocation6], %s1495_s23 }
 0x535   : > { %2099 = dma.done.wait (%p1745_p4), %s1496_s25, 128  }
 0x536   : > { %2101 = vsyncadd (%p1745_p4), %s1496_s25, 4294967168  ;;  %s33_s26 = sadd.s32 1, %s2124_s26   ;;  %s2671_s13 = sld [smem:[#allocation23_spill]] }
 0x537   : > { %p30_p7 = scmp.ge.s32.totalorder %s33_s26, 4   ;;  %s2672_s23 = sld [smem:[#allocation27_spill]] }
 0x538   : > { %s2673_s24 = sld [smem:[#allocation24_spill]]  ;;  %s2675_s21 = smov %s2108_s22 }
 0x539   : > { %s2674_s25 = sld [smem:[#allocation25_spill]]  ;;  %32 = sbr.rel (!%p30_p7) target bundleno = 17 (0x11), region = 146 }
 0x53c   : > { %s2676_s22 = smov %s2671_s13 }
 0x53e   :  { %1502 = vsyncpa [#allocation5], 1 }
 0x53f   :  { %1504 = vsyncpa [#allocation5 + $0x1], 1 }
 0x540   :  { %1505 = vsyncpa [#allocation8], 1 }
 0x541   :  { %1507 = vsyncpa [#allocation8 + $0x1], 1 }
 0x542   :  { %1508 = vsyncpa [#allocation11], 1 }
 0x543   :  { %1509 = vsyncpa [#allocation14], 1 }
 0x544   :  { %1510 = vsyncpa [#allocation6], 1 }
 0x545   :  { %1512 = vsyncpa [#allocation6 + $0x1], 1 }

</bundles_post_ra>
